<compile_context>
chip_gen: v7x
topology: tpu7x:2x2x1
jax: 0.10.0
libtpu: 0.0.40
codegen_flags: <defaults>
</compile_context>

<pallas_src>
import functools

import jax
import jax.numpy as jnp
from jax.experimental import pallas as pl
from jax.experimental.pallas import tpu as pltpu

INPUT_SIZE = 513
N_CLASS = 7
HID_1 = 256
HID_2 = 128

IN_PAD = 640      # 513 padded up to a multiple of 128
OUT_PAD = 128     # 7 classes padded up to one full lane tile
NEG_BIG = -1e30   # bias for padded class columns -> exp underflows to 0


def _round_up(a, m):
    return ((a + m - 1) // m) * m


def mlp_kernel(x_ref, w1_ref, b1_ref, w2_ref, b2_ref, w3_ref, b3_ref, o_ref):
    # x_ref: (TILE_B, IN_PAD) bf16;  weights bf16;  biases f32.
    x = x_ref[...]

    # fc1 + relu   (dropout1 is identity at inference)
    h1 = jnp.dot(x, w1_ref[...], preferred_element_type=jnp.float32) + b1_ref[...]
    h1 = jnp.maximum(h1, 0.0)

    # fc2 + relu   (dropout2 is identity at inference)
    h2 = jnp.dot(h1.astype(jnp.bfloat16), w2_ref[...],
                 preferred_element_type=jnp.float32) + b2_ref[...]
    h2 = jnp.maximum(h2, 0.0)

    # fc3 (padded class columns get zero weights + bias NEG_BIG -> exp == 0)
    logits = jnp.dot(h2.astype(jnp.bfloat16), w3_ref[...],
                     preferred_element_type=jnp.float32) + b3_ref[...]

    # log_softmax over last dim (numerically stable); exp/log run on the EUP.
    m = jnp.max(logits, axis=-1, keepdims=True)
    shifted = logits - m
    lse = jnp.log(jnp.sum(jnp.exp(shifted), axis=-1, keepdims=True))
    o_ref[...] = shifted - lse


def pack_params(params):
    """Pad + cast the f32 (in, out) params once, outside the kernel.

    Call this once and cache the result; the packed tuple is what the jitted
    forward consumes.
    """
    w1, b1, w2, b2, w3, b3 = params
    # Pad fc1 input dim 513 -> 640 with zero rows (zero rows x padded zero
    # input columns contribute nothing).
    w1p = jnp.pad(w1, ((0, IN_PAD - INPUT_SIZE), (0, 0)))
    # Pad fc3 output dim 7 -> 128; padded columns get zero weights and a huge
    # negative bias so they vanish in the softmax.
    w3p = jnp.pad(w3, ((0, 0), (0, OUT_PAD - N_CLASS)))
    b3p = jnp.pad(b3, ((0, 0), (0, OUT_PAD - N_CLASS)), constant_values=NEG_BIG)
    return (w1p.astype(jnp.bfloat16), b1.astype(jnp.float32),
            w2.astype(jnp.bfloat16), b2.astype(jnp.float32),
            w3p.astype(jnp.bfloat16), b3p.astype(jnp.float32))


@functools.partial(jax.jit, static_argnames=("tile_b",))
def _mlp_forward_padded(x_p, packed, tile_b):
    w1, b1, w2, b2, w3, b3 = packed
    Bp = x_p.shape[0]
    grid = (Bp // tile_b,)

    # Advisory cost for XLA's scheduler around the custom call.
    flops = 2 * Bp * (IN_PAD * HID_1 + HID_1 * HID_2 + HID_2 * OUT_PAD)
    transcendentals = Bp * (OUT_PAD + 1)                 # exp per logit + log per row
    bytes_accessed = (x_p.size * 2                       # bf16 activations in
                      + (w1.size + w2.size + w3.size) * 2
                      + (b1.size + b2.size + b3.size) * 4
                      + Bp * OUT_PAD * 4)                # f32 log-probs out

    const = lambda i: (0, 0)  # weights/biases stay resident across the grid
    out = pl.pallas_call(
        mlp_kernel,
        out_shape=jax.ShapeDtypeStruct((Bp, OUT_PAD), jnp.float32),
        grid=grid,
        in_specs=[
            pl.BlockSpec((tile_b, IN_PAD), lambda i: (i, 0)),
            pl.BlockSpec((IN_PAD, HID_1), const),
            pl.BlockSpec((1, HID_1), const),
            pl.BlockSpec((HID_1, HID_2), const),
            pl.BlockSpec((1, HID_2), const),
            pl.BlockSpec((HID_2, OUT_PAD), const),
            pl.BlockSpec((1, OUT_PAD), const),
        ],
        out_specs=pl.BlockSpec((tile_b, OUT_PAD), lambda i: (i, 0)),
        compiler_params=pltpu.CompilerParams(
            dimension_semantics=("parallel",),
            vmem_limit_bytes=48 * 1024 * 1024,
        ),
        cost_estimate=pl.CostEstimate(
            flops=flops,
            transcendentals=transcendentals,
            bytes_accessed=bytes_accessed,
        ),
    )(x_p, w1, b1, w2, b2, w3, b3)
    return out


def mlp_forward(x, params, *, max_tile_b=512):
    """x: (B, INPUT_SIZE) f32. Returns (B, N_CLASS) f32 log-probs."""
    packed = pack_params(params)
    B = x.shape[0]
    tile_b = min(max_tile_b, _round_up(B, 8))
    Bp = _round_up(B, tile_b)

    # Pad features 513 -> 640 and batch -> multiple of tile_b; cast to bf16.
    # Padded batch rows are all-zero -> finite garbage log-probs, sliced away.
    x_p = jnp.pad(x, ((0, Bp - B), (0, IN_PAD - INPUT_SIZE))).astype(jnp.bfloat16)

    out = _mlp_forward_padded(x_p, packed, tile_b)
    return out[:B, :N_CLASS]


def init_params(key):
    # Deterministic init, PyTorch-Linear-like bounds (U[-1/sqrt(fan_in), 1/sqrt(fan_in)]).
    def linear(key, fan_in, fan_out):
        kw, kb = jax.random.split(key)
        bound = 1.0 / jnp.sqrt(float(fan_in))
        w = jax.random.uniform(kw, (fan_in, fan_out), jnp.float32, -bound, bound)
        b = jax.random.uniform(kb, (1, fan_out), jnp.float32, -bound, bound)
        return w, b

    k1, k2, k3 = jax.random.split(key, 3)
    w1, b1 = linear(k1, INPUT_SIZE, HID_1)
    w2, b2 = linear(k2, HID_1, HID_2)
    w3, b3 = linear(k3, HID_2, N_CLASS)
    return (w1, b1, w2, b2, w3, b3)


if __name__ == "__main__":
    key = jax.random.PRNGKey(0)
    kp, kx = jax.random.split(key)
    params = init_params(kp)

    B = 8
    x = jax.random.normal(kx, (B, INPUT_SIZE), jnp.float32)

    out = mlp_forward(x, params)
    out = jax.block_until_ready(out)
    assert out.shape == (B, N_CLASS)

    # Reference 1: same bf16-operand quantization as the kernel (tight check).
    w1, b1, w2, b2, w3, b3 = params
    f32 = lambda a: a.astype(jnp.bfloat16).astype(jnp.float32)
    h1 = jnp.maximum(f32(x) @ f32(w1) + b1, 0.0)
    h2 = jnp.maximum(f32(h1) @ f32(w2) + b2, 0.0)
    logits = f32(h2) @ f32(w3) + b3
    ref_bf16 = jax.nn.log_softmax(logits, axis=-1)
    assert jnp.allclose(out, ref_bf16, atol=1e-3, rtol=1e-3)

    # Reference 2: full f32 PyTorch-equivalent forward (loose check).
    h1f = jnp.maximum(x @ w1 + b1, 0.0)
    h2f = jnp.maximum(h1f @ w2 + b2, 0.0)
    ref_f32 = jax.nn.log_softmax(h2f @ w3 + b3, axis=-1)
    assert jnp.allclose(out, ref_f32, atol=5e-2, rtol=5e-2)

    # Also exercise a multi-tile (grid > 1), non-multiple batch to check tiling.
    B2 = 300
    x2 = jax.random.normal(kx, (B2, INPUT_SIZE), jnp.float32)
    out2 = jax.block_until_ready(mlp_forward(x2, params, max_tile_b=128))
    h1f2 = jnp.maximum(x2 @ w1 + b1, 0.0)
    h2f2 = jnp.maximum(h1f2 @ w2 + b2, 0.0)
    ref2 = jax.nn.log_softmax(h2f2 @ w3 + b3, axis=-1)
    assert out2.shape == (B2, N_CLASS)
    assert jnp.allclose(out2, ref2, atol=5e-2, rtol=5e-2)

    print("KERNEL_OK")
</pallas_src>

<mosaic_0001>
module attributes {stable_mosaic.version = 11 : i64} {
  func.func @mlp_kernel(%arg0: i32, %arg1: memref<8x640xbf16, #tpu.memory_space<vmem>>, %arg2: memref<640x256xbf16, #tpu.memory_space<vmem>>, %arg3: memref<1x256xf32, #tpu.memory_space<vmem>>, %arg4: memref<256x128xbf16, #tpu.memory_space<vmem>>, %arg5: memref<1x128xf32, #tpu.memory_space<vmem>>, %arg6: memref<128x128xbf16, #tpu.memory_space<vmem>>, %arg7: memref<1x128xf32, #tpu.memory_space<vmem>>, %arg8: memref<8x128xf32, #tpu.memory_space<vmem>>) attributes {dimension_semantics = [#tpu.dimension_semantics<parallel>], iteration_bounds = array<i64: 1>, scalar_prefetch = 0 : i64, scratch_operands = 0 : i64, tpu.core_type = #tpu.core_type<tc>, window_params = [{transform_indices = @transform_0, window_bounds = array<i64: 8, 640>}, {pipeline_mode = #tpu.pipeline_mode<synchronous>, transform_indices = @transform_1, window_bounds = array<i64: 640, 256>}, {pipeline_mode = #tpu.pipeline_mode<synchronous>, transform_indices = @transform_2, window_bounds = array<i64: 1, 256>}, {pipeline_mode = #tpu.pipeline_mode<synchronous>, transform_indices = @transform_3, window_bounds = array<i64: 256, 128>}, {pipeline_mode = #tpu.pipeline_mode<synchronous>, transform_indices = @transform_4, window_bounds = array<i64: 1, 128>}, {pipeline_mode = #tpu.pipeline_mode<synchronous>, transform_indices = @transform_5, window_bounds = array<i64: 128, 128>}, {pipeline_mode = #tpu.pipeline_mode<synchronous>, transform_indices = @transform_6, window_bounds = array<i64: 1, 128>}, {transform_indices = @transform_7, window_bounds = array<i64: 8, 128>}]} {
    %c0 = arith.constant 0 : index
    %c0_0 = arith.constant 0 : index
    %0 = vector.load %arg1[%c0, %c0_0] : memref<8x640xbf16, #tpu.memory_space<vmem>>, vector<8x640xbf16>
    %c0_1 = arith.constant 0 : index
    %c0_2 = arith.constant 0 : index
    %1 = vector.load %arg2[%c0_1, %c0_2] : memref<640x256xbf16, #tpu.memory_space<vmem>>, vector<640x256xbf16>
    %cst = arith.constant dense<0.000000e+00> : vector<8x256xf32>
    %2 = tpu.matmul %0, %1, %cst {dimension_numbers = #tpu.dot_dimension_numbers<[1], [0], [0], [1], [0, 0, 1, 1], [], []>} : vector<8x640xbf16>, vector<640x256xbf16>, vector<8x256xf32> -> vector<8x256xf32>
    %c0_3 = arith.constant 0 : index
    %c0_4 = arith.constant 0 : index
    %3 = vector.load %arg3[%c0_3, %c0_4] : memref<1x256xf32, #tpu.memory_space<vmem>>, vector<1x256xf32>
    %4 = vector.broadcast %3 : vector<1x256xf32> to vector<8x256xf32>
    %5 = arith.addf %2, %4 : vector<8x256xf32>
    %cst_5 = arith.constant 0.000000e+00 : f32
    %6 = vector.broadcast %cst_5 : f32 to vector<8x256xf32>
    %7 = arith.maximumf %5, %6 : vector<8x256xf32>
    %8 = arith.truncf %7 : vector<8x256xf32> to vector<8x256xbf16>
    %c0_6 = arith.constant 0 : index
    %c0_7 = arith.constant 0 : index
    %9 = vector.load %arg4[%c0_6, %c0_7] : memref<256x128xbf16, #tpu.memory_space<vmem>>, vector<256x128xbf16>
    %cst_8 = arith.constant dense<0.000000e+00> : vector<8x128xf32>
    %10 = tpu.matmul %8, %9, %cst_8 {dimension_numbers = #tpu.dot_dimension_numbers<[1], [0], [0], [1], [0, 0, 1, 1], [], []>} : vector<8x256xbf16>, vector<256x128xbf16>, vector<8x128xf32> -> vector<8x128xf32>
    %c0_9 = arith.constant 0 : index
    %c0_10 = arith.constant 0 : index
    %11 = vector.load %arg5[%c0_9, %c0_10] : memref<1x128xf32, #tpu.memory_space<vmem>>, vector<1x128xf32>
    %12 = vector.broadcast %11 : vector<1x128xf32> to vector<8x128xf32>
    %13 = arith.addf %10, %12 : vector<8x128xf32>
    %cst_11 = arith.constant 0.000000e+00 : f32
    %14 = vector.broadcast %cst_11 : f32 to vector<8x128xf32>
    %15 = arith.maximumf %13, %14 : vector<8x128xf32>
    %16 = arith.truncf %15 : vector<8x128xf32> to vector<8x128xbf16>
    %c0_12 = arith.constant 0 : index
    %c0_13 = arith.constant 0 : index
    %17 = vector.load %arg6[%c0_12, %c0_13] : memref<128x128xbf16, #tpu.memory_space<vmem>>, vector<128x128xbf16>
    %cst_14 = arith.constant dense<0.000000e+00> : vector<8x128xf32>
    %18 = tpu.matmul %16, %17, %cst_14 {dimension_numbers = #tpu.dot_dimension_numbers<[1], [0], [0], [1], [0, 0, 1, 1], [], []>} : vector<8x128xbf16>, vector<128x128xbf16>, vector<8x128xf32> -> vector<8x128xf32>
    %c0_15 = arith.constant 0 : index
    %c0_16 = arith.constant 0 : index
    %19 = vector.load %arg7[%c0_15, %c0_16] : memref<1x128xf32, #tpu.memory_space<vmem>>, vector<1x128xf32>
    %20 = vector.broadcast %19 : vector<1x128xf32> to vector<8x128xf32>
    %21 = arith.addf %18, %20 : vector<8x128xf32>
    %cst_17 = arith.constant dense<0xFF800000> : vector<8xf32>
    %22 = vector.multi_reduction <maximumf>, %21, %cst_17 [1] : vector<8x128xf32> to vector<8xf32>
    %23 = vector.shape_cast %22 : vector<8xf32> to vector<8x1xf32>
    %24 = vector.broadcast %23 : vector<8x1xf32> to vector<8x128xf32>
    %25 = arith.subf %21, %24 : vector<8x128xf32>
    %26 = math.exp %25 : vector<8x128xf32>
    %cst_18 = arith.constant dense<0.000000e+00> : vector<8xf32>
    %27 = vector.multi_reduction <add>, %26, %cst_18 [1] : vector<8x128xf32> to vector<8xf32>
    %28 = vector.shape_cast %27 : vector<8xf32> to vector<8x1xf32>
    %29 = math.log %28 : vector<8x1xf32>
    %30 = vector.broadcast %29 : vector<8x1xf32> to vector<8x128xf32>
    %31 = arith.subf %25, %30 : vector<8x128xf32>
    %c0_19 = arith.constant 0 : index
    %c0_20 = arith.constant 0 : index
    %32 = vector.load %arg8[%c0_19, %c0_20] : memref<8x128xf32, #tpu.memory_space<vmem>>, vector<8x128xf32>
    tpu.vector_store %arg8[%c0_19, %c0_20], %31 {strides = array<i32>} : memref<8x128xf32, #tpu.memory_space<vmem>>, vector<8x128xf32>,
    return
  }
  func.func @transform_0(%arg0: i32) -> (i32, i32) {
    %c0_i32 = arith.constant 0 : i32
    %c0_i32_0 = arith.constant 0 : i32
    return %arg0, %c0_i32 : i32, i32
  }
  func.func @transform_1(%arg0: i32) -> (i32, i32) {
    %c0_i32 = arith.constant 0 : i32
    %c0_i32_0 = arith.constant 0 : i32
    %c0_i32_1 = arith.constant 0 : i32
    return %c0_i32, %c0_i32_0 : i32, i32
  }
  func.func @transform_2(%arg0: i32) -> (i32, i32) {
    %c0_i32 = arith.constant 0 : i32
    %c0_i32_0 = arith.constant 0 : i32
    %c0_i32_1 = arith.constant 0 : i32
    return %c0_i32, %c0_i32_0 : i32, i32
  }
  func.func @transform_3(%arg0: i32) -> (i32, i32) {
    %c0_i32 = arith.constant 0 : i32
    %c0_i32_0 = arith.constant 0 : i32
    %c0_i32_1 = arith.constant 0 : i32
    return %c0_i32, %c0_i32_0 : i32, i32
  }
  func.func @transform_4(%arg0: i32) -> (i32, i32) {
    %c0_i32 = arith.constant 0 : i32
    %c0_i32_0 = arith.constant 0 : i32
    %c0_i32_1 = arith.constant 0 : i32
    return %c0_i32, %c0_i32_0 : i32, i32
  }
  func.func @transform_5(%arg0: i32) -> (i32, i32) {
    %c0_i32 = arith.constant 0 : i32
    %c0_i32_0 = arith.constant 0 : i32
    %c0_i32_1 = arith.constant 0 : i32
    return %c0_i32, %c0_i32_0 : i32, i32
  }
  func.func @transform_6(%arg0: i32) -> (i32, i32) {
    %c0_i32 = arith.constant 0 : i32
    %c0_i32_0 = arith.constant 0 : i32
    %c0_i32_1 = arith.constant 0 : i32
    return %c0_i32, %c0_i32_0 : i32, i32
  }
  func.func @transform_7(%arg0: i32) -> (i32, i32) {
    %c0_i32 = arith.constant 0 : i32
    %c0_i32_0 = arith.constant 0 : i32
    return %arg0, %c0_i32 : i32, i32
  }
}

</mosaic_0001>

<bundles_post_ra>
// kernel: _mlp_forward_padded.1
= control target key start
LH: loop header
LB: loop body
LE: loop exit
PB: predicated region body
PF: predicated region fallthrough
CT: control target
= control target key end

     0   :  { %12 = vsyncpa [#allocation3], 0  ;;  %s1617_s0 = inlined_call_operand.hbm [shape: bf16[8,640], index: 0, kind: input, shape index: {}]   ;;  %s1618_s1 = inlined_call_operand.hbm [shape: bf16[640,256], index: 1, kind: input, shape index: {}]   ;;  %s1619_s2 = inlined_call_operand.vmem [shape: f32[1,256], index: 2, kind: input, shape index: {}]   ;;  %s1620_s3 = inlined_call_operand.hbm [shape: bf16[256,128], index: 3, kind: input, shape index: {}]   ;;  %s1621_s4 = inlined_call_operand.vmem [shape: f32[1,128], index: 4, kind: input, shape index: {}]   ;;  %s1622_s5 = inlined_call_operand.hbm [shape: bf16[128,128], index: 5, kind: input, shape index: {}]   ;;  %s1623_s6 = inlined_call_operand.vmem [shape: f32[1,128], index: 6, kind: input, shape index: {}]   ;;  %s1624_s7 = inlined_call_operand.hbm [shape: f32[8,128], index: 7, kind: output, shape index: {}]  }
   0x1   :  { %13 = vsyncpa [#allocation6], 0 }
   0x2   :  { %14 = vsyncpa [#allocation9], 0 }
   0x3   :  { %15 = vsyncpa [#allocation4], 0  ;;  %s1490_s24 = smov [#allocation5]   ;;  %s1372_s28 = scalar_lea.hbm %s1618_s1, 10240 }
   0x4   :  { %s31_s25 = sshll.u32 %s1490_s24, 4  ;;  %p1373_p0 = scmp.ne.s32.totalorder %s1618_s1, %s1372_s28  ;;  %s32_s25 = int_to_ptr.vmem [resolvable:$true] %s31_s25 }
   0x5   :  { %p1376_p1 = scmp.lt.u32.totalorder %s1372_s28, %s1618_s1 }
   0x7   :  { %p1378_p2 = pnand %p1376_p1, %p1373_p0 }
   0x9   :  { %1381 = shalt.err (!%p1378_p2)
}
   0xa   :  { %s1382_s10 = scalar_lea.vmem %s32_s25, 10240  ;;  %p1387_p4 = scmp.lt.s32.totalorder %s32_s25, %s32_s25 }
   0xb   :  { %p1383_p3 = scmp.ne.s32.totalorder %s32_s25, %s1382_s10  ;;  %p1388_p5 = scmp.lt.s32.totalorder %s1382_s10, %s1382_s10 }
   0xd   :  { %p1389_p6 = por %p1388_p5, %p1387_p4 }
   0xf   :  { %p1390_p7 = pnand %p1389_p6, %p1383_p3 }
  0x11   :  { %1393 = shalt.err (!%p1390_p7)
}
  0x12   :  { %s1491_s11 = smov 128   ;;  %s1492_s12 = smov 8  }
  0x13   :  { %37 = dma.hbm_to_vmem [thread:$0]  %s1618_s1, 10240, %s32_s25, [#allocation6], %s1491_s11, %s1491_s11, %s1492_s12  }
  0x14   :  { %s1493_s15 = smov [#allocation2]   ;;  %s1494_s17 = smov [#allocation7]  }
  0x15   :  { %s22_s16 = sshll.u32 %s1493_s15, 4  ;;  %s45_s18 = sshll.u32 %s1494_s17, 4  ;;  %s23_s16 = int_to_ptr.vmem [resolvable:$true] %s22_s16  ;;  %s46_s18 = int_to_ptr.vmem [resolvable:$true] %s45_s18 }
  0x16   :  { %s1394_s21 = scalar_lea.hbm %s1617_s0, 320 }
  0x17   :  { %p1395_p8 = scmp.ne.s32.totalorder %s1617_s0, %s1394_s21  ;;  %p1398_p9 = scmp.lt.u32.totalorder %s1394_s21, %s1617_s0 }
  0x19   :  { %p1400_p10 = pnand %p1398_p9, %p1395_p8 }
  0x1b   :  { %1403 = shalt.err (!%p1400_p10)
}
  0x1c   :  { %s1404_s1 = scalar_lea.vmem %s23_s16, 320  ;;  %p1409_p12 = scmp.lt.s32.totalorder %s23_s16, %s23_s16 }
  0x1d   :  { %p1405_p11 = scmp.ne.s32.totalorder %s23_s16, %s1404_s1  ;;  %p1410_p13 = scmp.lt.s32.totalorder %s1404_s1, %s1404_s1 }
  0x1f   :  { %p1411_p0 = por %p1410_p13, %p1409_p12 }
  0x21   :  { %p1412_p1 = pnand %p1411_p0, %p1405_p11 }
  0x23   :  { %1415 = shalt.err (!%p1412_p1)
}
  0x24   :  { %25 = dma.hbm_to_vmem [thread:$0]  %s1617_s0, 320, %s23_s16, [#allocation3]  }
  0x25   :  { %s1416_s30 = scalar_lea.hbm %s1620_s3, 2048 }
  0x26   :  { %p1417_p2 = scmp.ne.s32.totalorder %s1620_s3, %s1416_s30  ;;  %p1420_p3 = scmp.lt.u32.totalorder %s1416_s30, %s1620_s3 }
  0x28   :  { %p1422_p4 = pnand %p1420_p3, %p1417_p2 }
  0x2a   :  { %1425 = shalt.err (!%p1422_p4)
}
  0x2b   :  { %s1426_s12 = scalar_lea.vmem %s46_s18, 2048  ;;  %p1431_p6 = scmp.lt.s32.totalorder %s46_s18, %s46_s18 }
  0x2c   :  { %p1427_p5 = scmp.ne.s32.totalorder %s46_s18, %s1426_s12  ;;  %p1432_p7 = scmp.lt.s32.totalorder %s1426_s12, %s1426_s12 }
  0x2e   :  { %p1433_p8 = por %p1432_p7, %p1431_p6 }
  0x30   :  { %p1434_p9 = pnand %p1433_p8, %p1427_p5 }
  0x32   :  { %1437 = shalt.err (!%p1434_p9)
}
  0x33   :  { %s1495_s0 = smov 64   ;;  %s1496_s13 = smov 4  }
  0x34   :  { %51 = dma.hbm_to_vmem [thread:$0]  %s1620_s3, 2048, %s46_s18, [#allocation6], %s1495_s0, %s1495_s0, %s1496_s13  }
  0x35   :  { %s1497_s16 = smov [#allocation8]   ;;  %s1438_s21 = scalar_lea.hbm %s1622_s5, 1024 }
  0x36   :  { %s59_s17 = sshll.u32 %s1497_s16, 4  ;;  %p1439_p10 = scmp.ne.s32.totalorder %s1622_s5, %s1438_s21  ;;  %s60_s17 = int_to_ptr.vmem [resolvable:$true] %s59_s17 }
  0x37   :  { %p1442_p11 = scmp.lt.u32.totalorder %s1438_s21, %s1622_s5 }
  0x39   :  { %p1444_p12 = pnand %p1442_p11, %p1439_p10 }
  0x3b   :  { %1447 = shalt.err (!%p1444_p12)
}
  0x3c   :  { %s1448_s1 = scalar_lea.vmem %s60_s17, 1024  ;;  %p1453_p0 = scmp.lt.s32.totalorder %s60_s17, %s60_s17 }
  0x3d   :  { %p1449_p13 = scmp.ne.s32.totalorder %s60_s17, %s1448_s1  ;;  %p1454_p1 = scmp.lt.s32.totalorder %s1448_s1, %s1448_s1 }
  0x3f   :  { %p1455_p2 = por %p1454_p1, %p1453_p0 }
  0x41   :  { %p1456_p3 = pnand %p1455_p2, %p1449_p13 }
  0x43   :  { %1459 = shalt.err (!%p1456_p3)
}
  0x44   :  { %65 = dma.hbm_to_vmem [thread:$0]  %s1622_s5, 1024, %s60_s17, [#allocation9], %s1495_s0, %s1495_s0, %s1496_s13  }
  0x45   :  { %1482 = dma.done.wait [#allocation3], 320  }
  0x46   :  { %1483 = vsyncadd [#allocation3], 4294966976 }
  0x47   :  { %1484 = dma.done.wait [#allocation6], 12288  }
  0x48   :  { %1485 = vsyncadd [#allocation6], 4294955008 }
  0x49   :  { %1486 = dma.done.wait [#allocation9], 1024  }
  0x4a   :  { %1487 = vsyncadd [#allocation9], 4294966272  ;;  %v1219_v0 = vld [vmem:[#allocation5 + $0x104] ss:$8 sps:$4 sm:$0xff]   ;;  %v1221_v1 = vld [vmem:[#allocation5 + $0x100] ss:$8 sps:$4 sm:$0xff]  }
  0x4b   :  { %635 = vmatprep.subr.bf16.mxu0 %v1219_v0  ;;  %v1222_v2 = vld [vmem:[#allocation5 + $0x114] ss:$8 sps:$4 sm:$0xff]   ;;  %v1224_v3 = vld [vmem:[#allocation5 + $0x110] ss:$8 sps:$4 sm:$0xff]   ;;  %v1225_v4 = vld [vmem:[#allocation5 + $0x124] ss:$8 sps:$4 sm:$0xff]  }
  0x4c   :  { %636 = vmatpush1.bf16.msra.mxu0 %v1221_v1  ;;  %v1227_v5 = vld [vmem:[#allocation5 + $0x120] ss:$8 sps:$4 sm:$0xff]   ;;  %v1228_v6 = vld [vmem:[#allocation5 + $0x134] ss:$8 sps:$4 sm:$0xff]   ;;  %v1240_v7 = vld [vmem:[#allocation5 + $0x4] ss:$8 sps:$4 sm:$0xff]  }
  0x4d   :  { %637 = vmatprep.subr.bf16.mxu0 %v1222_v2  ;;  %v1242_v8 = vld [vmem:[#allocation5] ss:$8 sps:$4 sm:$0xff]   ;;  %v1230_v9 = vld [vmem:[#allocation5 + $0x130] ss:$8 sps:$4 sm:$0xff]   ;;  %v1231_v10 = vld [vmem:[#allocation5 + $0x144] ss:$8 sps:$4 sm:$0xff]   ;;  %594 = vmatprep.subr.bf16.mxu1 %v1240_v7 }
  0x4e   :  { %v1246_v11 = vld [vmem:[#allocation5 + $0x14] ss:$8 sps:$4 sm:$0xff]   ;;  %595 = vmatpush1.bf16.msra.mxu1 %v1242_v8  ;;  %v1248_v12 = vld [vmem:[#allocation5 + $0x10] ss:$8 sps:$4 sm:$0xff]   ;;  %v1233_v13 = vld [vmem:[#allocation5 + $0x140] ss:$8 sps:$4 sm:$0xff]  }
  0x4f   :  { %596 = vmatprep.subr.bf16.mxu1 %v1246_v11  ;;  %v1252_v14 = vld [vmem:[#allocation5 + $0x24] ss:$8 sps:$4 sm:$0xff]   ;;  %v1234_v15 = vld [vmem:[#allocation5 + $0x154] ss:$8 sps:$4 sm:$0xff]   ;;  %v1254_v16 = vld [vmem:[#allocation5 + $0x20] ss:$8 sps:$4 sm:$0xff]  }
  0x50   :  { %638 = vmatpush1.bf16.msra.mxu0 %v1224_v3  ;;  %v1258_v17 = vld [vmem:[#allocation5 + $0x34] ss:$8 sps:$4 sm:$0xff]   ;;  %v1236_v18 = vld [vmem:[#allocation5 + $0x150] ss:$8 sps:$4 sm:$0xff]   ;;  %v1237_v19 = vld [vmem:[#allocation5 + $0x164] ss:$8 sps:$4 sm:$0xff]  }
  0x51   :  { %639 = vmatprep.subr.bf16.mxu0 %v1225_v4  ;;  %v1260_v20 = vld [vmem:[#allocation5 + $0x30] ss:$8 sps:$4 sm:$0xff]   ;;  %v1264_v21 = vld [vmem:[#allocation5 + $0x44] ss:$8 sps:$4 sm:$0xff]   ;;  %v1239_v22 = vld [vmem:[#allocation5 + $0x160] ss:$8 sps:$4 sm:$0xff]  }
  0x52   :  { %597 = vmatpush1.bf16.msra.mxu1 %v1248_v12  ;;  %v1243_v23 = vld [vmem:[#allocation5 + $0x174] ss:$8 sps:$4 sm:$0xff]   ;;  %v1266_v24 = vld [vmem:[#allocation5 + $0x40] ss:$8 sps:$4 sm:$0xff]   ;;  %v1245_v26 = vld [vmem:[#allocation5 + $0x170] ss:$8 sps:$4 sm:$0xff]  }
  0x53   :  { %598 = vmatprep.subr.bf16.mxu1 %v1252_v14  ;;  %v1270_v25 = vld [vmem:[#allocation5 + $0x54] ss:$8 sps:$4 sm:$0xff]   ;;  %v1249_v27 = vld [vmem:[#allocation5 + $0x184] ss:$8 sps:$4 sm:$0xff]   ;;  %v1272_v28 = vld [vmem:[#allocation5 + $0x50] ss:$8 sps:$4 sm:$0xff]  }
  0x54   :  { %640 = vmatpush1.bf16.msra.mxu0 %v1227_v5  ;;  %v1276_v29 = vld [vmem:[#allocation5 + $0x64] ss:$8 sps:$4 sm:$0xff]   ;;  %v1251_v30 = vld [vmem:[#allocation5 + $0x180] ss:$8 sps:$4 sm:$0xff]   ;;  %v1255_v31 = vld [vmem:[#allocation5 + $0x194] ss:$8 sps:$4 sm:$0xff]  }
  0x55   :  { %641 = vmatprep.subr.bf16.mxu0 %v1228_v6  ;;  %v1278_v32 = vld [vmem:[#allocation5 + $0x60] ss:$8 sps:$4 sm:$0xff]   ;;  %v1282_v33 = vld [vmem:[#allocation5 + $0x74] ss:$8 sps:$4 sm:$0xff]   ;;  %v1257_v35 = vld [vmem:[#allocation5 + $0x190] ss:$8 sps:$4 sm:$0xff]  }
  0x56   :  { %599 = vmatpush1.bf16.msra.mxu1 %v1254_v16  ;;  %v1590_v34 = vld [vmem:[#allocation2 + $0x8] sm:$0xff]  ;;  %v1261_v37 = vld [vmem:[#allocation5 + $0x1a4] ss:$8 sps:$4 sm:$0xff]   ;;  %v1263_v40 = vld [vmem:[#allocation5 + $0x1a0] ss:$8 sps:$4 sm:$0xff]   ;;  %vm1500_vm0 = vmmov 0  }
  0x57   :  { %600 = vmatprep.subr.bf16.mxu1 %v1258_v17  ;;  %v1040_v36 = vcombine.high %v1590_v34, %v1590_v34  ;;  %v1284_v38 = vld [vmem:[#allocation5 + $0x70] ss:$8 sps:$4 sm:$0xff]   ;;  %v1288_v39 = vld [vmem:[#allocation5 + $0x84] ss:$8 sps:$4 sm:$0xff]   ;;  %v1267_v41 = vld [vmem:[#allocation5 + $0x1b4] ss:$8 sps:$4 sm:$0xff]   ;;  %v1039_v2 = vcombine.low %v1590_v34, %v1590_v34 }
  0x58   :  { %642 = vmatpush1.bf16.msra.mxu0 %v1230_v9  ;;  %v1290_v42 = vld [vmem:[#allocation5 + $0x80] ss:$8 sps:$4 sm:$0xff]   ;;  %v1294_v43 = vld [vmem:[#allocation5 + $0x94] ss:$8 sps:$4 sm:$0xff]   ;;  %v1269_v44 = vld [vmem:[#allocation5 + $0x1b0] ss:$8 sps:$4 sm:$0xff]  }
  0x59   :  { %643 = vmatprep.subr.bf16.mxu0 %v1231_v10  ;;  %667 = vmatprep.mubr.bf16.mxu0 %v1040_v36  ;;  %v1273_v45 = vld [vmem:[#allocation5 + $0x1c4] ss:$8 sps:$4 sm:$0xff]   ;;  %v1296_v46 = vld [vmem:[#allocation5 + $0x90] ss:$8 sps:$4 sm:$0xff]   ;;  %v1275_v48 = vld [vmem:[#allocation5 + $0x1c0] ss:$8 sps:$4 sm:$0xff]  }
  0x5a   :  { %601 = vmatpush1.bf16.msra.mxu1 %v1260_v20  ;;  %v1302_v47 = vld [vmem:[#allocation5 + $0xa4] ss:$8 sps:$4 sm:$0xff]   ;;  %v1279_v49 = vld [vmem:[#allocation5 + $0x1d4] ss:$8 sps:$4 sm:$0xff]   ;;  %v1304_v50 = vld [vmem:[#allocation5 + $0xa0] ss:$8 sps:$4 sm:$0xff]  }
  0x5b   :  { %602 = vmatprep.subr.bf16.mxu1 %v1264_v21  ;;  %v1308_v51 = vld [vmem:[#allocation5 + $0xb4] ss:$8 sps:$4 sm:$0xff]   ;;  %v1281_v52 = vld [vmem:[#allocation5 + $0x1d0] ss:$8 sps:$4 sm:$0xff]   ;;  %v1285_v53 = vld [vmem:[#allocation5 + $0x1e4] ss:$8 sps:$4 sm:$0xff]  }
  0x5c   :  { %644 = vmatpush1.bf16.msra.mxu0 %v1233_v13  ;;  %v81_v54 = vld [vmem:[#allocation2] sm:$0xff]  ;;  %v1287_v58 = vld [vmem:[#allocation5 + $0x1e0] ss:$8 sps:$4 sm:$0xff]   ;;  %v1291_v59 = vld [vmem:[#allocation5 + $0x1f4] ss:$8 sps:$4 sm:$0xff]   ;;  %v1498_v10 = vmov 0  }
  0x5d   :  { %645 = vmatprep.subr.bf16.mxu0 %v1234_v15  ;;  %v1310_v55 = vld [vmem:[#allocation5 + $0xb0] ss:$8 sps:$4 sm:$0xff]   ;;  %v1038_v56 = vcombine.high %v81_v54, %v81_v54  ;;  %v1314_v57 = vld [vmem:[#allocation5 + $0xc4] ss:$8 sps:$4 sm:$0xff]   ;;  %v1316_v60 = vld [vmem:[#allocation5 + $0xc0] ss:$8 sps:$4 sm:$0xff]   ;;  %v1037_v15 = vcombine.low %v81_v54, %v81_v54 }
  0x5e   :  { %603 = vmatpush1.bf16.msra.mxu1 %v1266_v24  ;;  %v1320_v61 = vld [vmem:[#allocation5 + $0xd4] ss:$8 sps:$4 sm:$0xff]   ;;  %v1293_v62 = vld [vmem:[#allocation5 + $0x1f0] ss:$8 sps:$4 sm:$0xff]   ;;  %v1301_v63 = vld [vmem:[#allocation5 + $0x204] ss:$8 sps:$4 sm:$0xff]  }
  0x5f   :  { %604 = vmatprep.subr.bf16.mxu1 %v1270_v25  ;;  %626 = vmatprep.mubr.bf16.mxu1 %v1038_v56  ;;  %v1299_v0 = vld [vmem:[#allocation5 + $0x200] ss:$8 sps:$4 sm:$0xff]   ;;  %v1322_v1 = vld [vmem:[#allocation5 + $0xd0] ss:$8 sps:$4 sm:$0xff]   ;;  %v1326_v3 = vld [vmem:[#allocation5 + $0xe4] ss:$8 sps:$4 sm:$0xff]  }
  0x60   :  { %646 = vmatpush1.bf16.msra.mxu0 %v1236_v18  ;;  %v1307_v4 = vld [vmem:[#allocation5 + $0x214] ss:$8 sps:$4 sm:$0xff]   ;;  %v1328_v5 = vld [vmem:[#allocation5 + $0xe0] ss:$8 sps:$4 sm:$0xff]   ;;  %v1305_v7 = vld [vmem:[#allocation5 + $0x210] ss:$8 sps:$4 sm:$0xff]  }
  0x61   :  { %647 = vmatprep.subr.bf16.mxu0 %v1237_v19  ;;  %v1332_v6 = vld [vmem:[#allocation5 + $0xf4] ss:$8 sps:$4 sm:$0xff]   ;;  %v1313_v8 = vld [vmem:[#allocation5 + $0x224] ss:$8 sps:$4 sm:$0xff]   ;;  %v1334_v9 = vld [vmem:[#allocation5 + $0xf0] ss:$8 sps:$4 sm:$0xff]  }
  0x62   :  { %605 = vmatpush1.bf16.msra.mxu1 %v1272_v28  ;;  %v1344_v11 = vld [vmem:[#allocation7 + $0x40] sm:$0xff]   ;;  %v1319_v13 = vld [vmem:[#allocation5 + $0x234] ss:$8 sps:$4 sm:$0xff]   ;;  %v1346_v16 = vld [vmem:[#allocation7 + $0x48] sm:$0xff]  }
  0x63   :  { %606 = vmatprep.subr.bf16.mxu1 %v1276_v29  ;;  %v1311_v12 = vld [vmem:[#allocation5 + $0x220] ss:$8 sps:$4 sm:$0xff]   ;;  %v1317_v17 = vld [vmem:[#allocation5 + $0x230] ss:$8 sps:$4 sm:$0xff]   ;;  %v1325_v18 = vld [vmem:[#allocation5 + $0x244] ss:$8 sps:$4 sm:$0xff]  }
  0x64   :  { %648 = vmatpush1.bf16.msra.mxu0 %v1239_v22  ;;  %v1345_v14 = vld [vmem:[#allocation7] sm:$0xff]   ;;  %v1347_v19 = vld [vmem:[#allocation7 + $0x8] sm:$0xff]   ;;  %v1348_v20 = vld [vmem:[#allocation7 + $0x50] sm:$0xff]  }
  0x65   :  { %649 = vmatprep.subr.bf16.mxu0 %v1243_v23  ;;  %v1323_v21 = vld [vmem:[#allocation5 + $0x240] ss:$8 sps:$4 sm:$0xff]   ;;  %v1331_v22 = vld [vmem:[#allocation5 + $0x254] ss:$8 sps:$4 sm:$0xff]   ;;  %v1329_v25 = vld [vmem:[#allocation5 + $0x250] ss:$8 sps:$4 sm:$0xff]  }
  0x66   :  { %607 = vmatpush1.bf16.msra.mxu1 %v1278_v32  ;;  %v1349_v23 = vld [vmem:[#allocation7 + $0x10] sm:$0xff]   ;;  %v1350_v24 = vld [vmem:[#allocation7 + $0x58] sm:$0xff]   ;;  %v1352_v28 = vld [vmem:[#allocation7 + $0x60] sm:$0xff]  }
  0x67   :  { %608 = vmatprep.subr.bf16.mxu1 %v1282_v33  ;;  %v1335_v29 = vld [vmem:[#allocation5 + $0x260] ss:$8 sps:$4 sm:$0xff]   ;;  %v1340_v32 = vld [vmem:[#allocation5 + $0x270] ss:$8 sps:$4 sm:$0xff]   ;;  %v1343_v33 = vld [vmem:[#allocation2 + $0x10] ss:$0 sps:$4 sm:$0xff]  }
  0x68   :  { %650 = vmatpush1.bf16.msra.mxu0 %v1245_v26  ;;  %v1337_v26 = vld [vmem:[#allocation5 + $0x264] ss:$8 sps:$4 sm:$0xff]   ;;  %v1356_v36 = vld [vmem:[#allocation7 + $0x70] sm:$0xff]  }
  0x69   :  { %651 = vmatprep.subr.bf16.mxu0 %v1249_v27  ;;  %v1351_v27 = vld [vmem:[#allocation7 + $0x18] sm:$0xff]   ;;  %v1354_v34 = vld [vmem:[#allocation7 + $0x68] sm:$0xff]  }
  0x6a   :  { %609 = vmatpush1.bf16.msra.mxu1 %v1284_v38  ;;  %v1358_v38 = vld [vmem:[#allocation7 + $0x78] sm:$0xff]  }
  0x6b   :  { %610 = vmatprep.subr.bf16.mxu1 %v1288_v39  ;;  %v1359_v39 = vld [vmem:[#allocation7 + $0x38] sm:$0xff]  }
  0x6c   :  { %652 = vmatpush1.bf16.msra.mxu0 %v1251_v30  ;;  %v1342_v30 = vld [vmem:[#allocation5 + $0x274] ss:$8 sps:$4 sm:$0xff]  }
  0x6d   :  { %653 = vmatprep.subr.bf16.mxu0 %v1255_v31  ;;  %v1353_v31 = vld [vmem:[#allocation7 + $0x20] sm:$0xff]  }
  0x6e   :  { %611 = vmatpush1.bf16.msra.mxu1 %v1290_v42 }
  0x6f   :  { %612 = vmatprep.subr.bf16.mxu1 %v1294_v43 }
  0x70   :  { %654 = vmatpush1.bf16.msra.mxu0 %v1257_v35  ;;  %v1355_v35 = vld [vmem:[#allocation7 + $0x28] sm:$0xff]  }
  0x71   :  { %655 = vmatprep.subr.bf16.mxu0 %v1261_v37  ;;  %v1357_v37 = vld [vmem:[#allocation7 + $0x30] sm:$0xff]  }
  0x72   :  { %613 = vmatpush1.bf16.msra.mxu1 %v1296_v46 }
  0x73   :  { %614 = vmatprep.subr.bf16.mxu1 %v1302_v47 }
  0x74   :  { %656 = vmatpush1.bf16.msra.mxu0 %v1263_v40  ;;  %v1499_v40 = vmov 0.0  }
  0x75   :  { %657 = vmatprep.subr.bf16.mxu0 %v1267_v41 }
  0x76   :  { %615 = vmatpush1.bf16.msra.mxu1 %v1304_v50 }
  0x77   :  { %616 = vmatprep.subr.bf16.mxu1 %v1308_v51 }
  0x78   :  { %658 = vmatpush1.bf16.msra.mxu0 %v1269_v44  ;;  %v166_v44 = vlaneseq }
  0x79   :  { %659 = vmatprep.subr.bf16.mxu0 %v1273_v45 }
  0x7a   :  { %617 = vmatpush1.bf16.msra.mxu1 %v1310_v55  ;;  %v167_v46 = vshrl.u32 %v166_v44, 7 }
  0x7b   :  { %618 = vmatprep.subr.bf16.mxu1 %v1314_v57 }
  0x7c   :  { %660 = vmatpush1.bf16.msra.mxu0 %v1275_v48  ;;  %v168_v47 = vsub.s32 0, %v167_v46  ;;  %v164_v48 = vld [vmem:[%s1619_s2] sm:$0x3] }
  0x7d   :  { %661 = vmatprep.subr.bf16.mxu0 %v1279_v49  ;;  %v172_v49 = vsub.s32 1, %v167_v46 }
  0x7e   :  { %619 = vmatpush1.bf16.msra.mxu1 %v1316_v60  ;;  %v169_v50 = vrot.slane %v164_v48, %v168_v47 }
  0x7f   :  { %620 = vmatprep.subr.bf16.mxu1 %v1320_v61  ;;  %v173_v51 = vrot.slane %v164_v48, %v172_v49 }
  0x80   :  { %662 = vmatpush1.bf16.msra.mxu0 %v1281_v52 }
  0x81   :  { %663 = vmatprep.subr.bf16.mxu0 %v1285_v53 }
  0x82   :  { %621 = vmatpush1.bf16.msra.mxu1 %v1322_v1  ;;  %v1361_v1 = vld [vmem:[#allocation8 + $0x8] sm:$0xff]  }
  0x83   :  { %622 = vmatprep.subr.bf16.mxu1 %v1326_v3  ;;  %v1363_v3 = vld [vmem:[#allocation8 + $0x18] sm:$0xff]  }
  0x84   :  { %664 = vmatpush1.bf16.msra.mxu0 %v1287_v58 }
  0x85   :  { %665 = vmatprep.subr.bf16.mxu0 %v1291_v59 }
  0x86   :  { %623 = vmatpush1.bf16.msra.mxu1 %v1328_v5  ;;  %v1365_v5 = vld [vmem:[#allocation8 + $0x28] sm:$0xff]  }
  0x87   :  { %624 = vmatprep.subr.bf16.mxu1 %v1332_v6  ;;  %v1366_v6 = vld [vmem:[#allocation8 + $0x30] sm:$0xff]  }
  0x88   :  { %666 = vmatpush1.bf16.msra.mxu0 %v1293_v62 }
  0x89   :  { %676 = vmatprep.subr.bf16.mxu0 %v1301_v63  ;;  %v1360_v63 = vld [vmem:[#allocation8] sm:$0xff]  }
  0x8a   :  { %625 = vmatpush1.bf16.msra.mxu1 %v1334_v9  ;;  %v1122_v9 = vld [vmem:[%s1621_s4] ss:$0 sm:$0xff]  ;;  %s1501_s4 = smov [#allocation10]  }
  0x8b   :  { %668 = vmatmul.mubr.bf16.vlgmr.msra.gmra.mrb[0].mxu0 %v1039_v2  ;;  %1148 = vmatprep.subr.bf16.mxu1 %v1344_v11  ;;  %v1362_v2 = vld [vmem:[#allocation8 + $0x10] sm:$0xff]   ;;  %s1026_s30 = sshll.u32 %s1501_s4, 4  ;;  %s1027_s30 = int_to_ptr.vmem [resolvable:$true] %s1026_s30 }
  0x8c   :  { %677 = vmatpush1.bf16.msra.mxu0 %v1299_v0  ;;  %708 = vmatprep.mubr.bf16.mxu0 %v1498_v10  ;;  %p1465_p5 = scmp.lt.s32.totalorder %s1027_s30, %s1027_s30 }
  0x8d   :  { %678 = vmatprep.subr.bf16.mxu0 %v1307_v4  ;;  %627 = vmatmul.mubr.bf16.vlgmr.msra.gmra.mrb[0].mxu1 %v1037_v15  ;;  %v1364_v4 = vld [vmem:[#allocation8 + $0x20] sm:$0xff]  }
  0x8e   :  { %1149 = vmatpush3.bf16.msra.mxu1 %v1345_v14 }
  0x8f   :  { %1150 = vmatprep.subr.bf16.mxu1 %v1346_v16 }
  0x90   :  { %679 = vmatpush1.bf16.msra.mxu0 %v1305_v7  ;;  %v1367_v7 = vld [vmem:[#allocation8 + $0x38] sm:$0xff]  }
  0x91   :  { %680 = vmatprep.subr.bf16.mxu0 %v1313_v8 }
  0x92   :  { %1151 = vmatpush3.bf16.msra.mxu1 %v1347_v19 }
  0x93   :  { %1152 = vmatprep.subr.bf16.mxu1 %v1348_v20 }
  0x94   :  { %681 = vmatpush1.bf16.msra.mxu0 %v1311_v12 }
  0x95   :  { %682 = vmatprep.subr.bf16.mxu0 %v1319_v13 }
  0x96   :  { %1153 = vmatpush3.bf16.msra.mxu1 %v1349_v23 }
  0x97   :  { %1154 = vmatprep.subr.bf16.mxu1 %v1350_v24 }
  0x98   :  { %683 = vmatpush1.bf16.msra.mxu0 %v1317_v17  ;;  %v1139_v17 = vld [vmem:[%s1623_s6] ss:$0 sm:$0xff]  ;;  %s1460_s6 = scalar_lea.vmem %s1027_s30, 128 }
  0x99   :  { %684 = vmatprep.subr.bf16.mxu0 %v1325_v18  ;;  %p1461_p4 = scmp.ne.s32.totalorder %s1027_s30, %s1460_s6  ;;  %p1466_p6 = scmp.lt.s32.totalorder %s1460_s6, %s1460_s6 }
  0x9a   :  { %1155 = vmatpush3.bf16.msra.mxu1 %v1351_v27 }
  0x9b   :  { %1156 = vmatprep.subr.bf16.mxu1 %v1352_v28  ;;  %p1467_p7 = por %p1466_p6, %p1465_p5 }
  0x9c   :  { %685 = vmatpush1.bf16.msra.mxu0 %v1323_v21 }
  0x9d   :  { %686 = vmatprep.subr.bf16.mxu0 %v1331_v22  ;;  %p1468_p8 = pnand %p1467_p7, %p1461_p4 }
  0x9e   :  { %1157 = vmatpush3.bf16.msra.mxu1 %v1353_v31 }
  0x9f   :  { %1158 = vmatprep.subr.bf16.mxu1 %v1354_v34 }
  0xa0   :  { %687 = vmatpush1.bf16.msra.mxu0 %v1329_v25 }
  0xa1   :  { %688 = vmatprep.subr.bf16.mxu0 %v1337_v26 }
  0xa2   :  { %1159 = vmatpush3.bf16.msra.mxu1 %v1355_v35 }
  0xa3   :  { %1160 = vmatprep.subr.bf16.mxu1 %v1356_v36 }
  0xa4   :  { %689 = vmatpush1.bf16.msra.mxu0 %v1335_v29 }
  0xa5   :  { %690 = vmatprep.subr.bf16.mxu0 %v1342_v30 }
  0xa6   :  { %1161 = vmatpush3.bf16.msra.mxu1 %v1357_v37 }
  0xa7   :  { %1162 = vmatprep.subr.bf16.mxu1 %v1358_v38 }
  0xa8   :  { %691 = vmatpush1.bf16.msra.mxu0 %v1340_v32 }
  0xaa   :  { %1163 = vmatpush3.bf16.msra.mxu1 %v1359_v39 }
  0xab   :  { %709 = vmatmul.mubr.bf16.vlgmr.msra.gmra.mrb[0].mxu0 %v1343_v33  ;;  %1179 = vmatprep.subr.bf16.mxu1 %v1499_v40 }
 0x160   :  { %v628_v41 = vpop.f32.mrb[0].mxu1 }
 0x161   :  { %v630_v42 = vpop.f32.mrb[1].mxu1  ;;  %v629_v52 = vadd.f32 %v628_v41, %v169_v50 }
 0x162   :  { %v632_v43 = vpop.f32.mrb[2].mxu1  ;;  %v631_v53 = vadd.f32 %v630_v42, %v173_v51 }
 0x163   :  { %v633_v45 = vpop.f32.mrb[3].mxu1 }
 0x17e   :  { %v710_v54 = vpop.f32.mrb[0].mxu0 }
 0x17f   :  { %v1200_v55 = vadd.f32 %v710_v54, %v629_v52  ;;  %v712_v56 = vpop.f32.mrb[1].mxu0 }
 0x180   :  { %v1202_v57 = vadd.f32 %v712_v56, %v631_v53  ;;  %v714_v58 = vpop.f32.mrb[2].mxu0 }
 0x181   :  { %v717_v59 = vmax.f32 %v1200_v55, 0.0  ;;  %v715_v60 = vpop.f32.mrb[3].mxu0 }
 0x182   :  { %v718_v61 = vmax.f32 %v1202_v57, 0.0 }
 0x183   :  { %v719_v0 = vpack.c.bf16 %v717_v59, %v717_v59 }
 0x184   :  { %v720_v62 = vpack.c.bf16 %v718_v61, %v718_v61 }
 0x186   :  { %888 = vmatprep.mubr.bf16.mxu1 %v720_v62 }
 0x187   :  { %889 = vmatmul.mubr.bf16.vlgmr.msra.gmra.mrb[4].mxu1 %v719_v0 }
 0x188   :  { %1180 = vmatpush3.bf16.msra.mxu1 %v1360_v63  ;;  %1195 = vmatprep.mubr.msk.bf16.mxu1 %vm1500_vm0, %v1499_v40 }
 0x189   :  { %1181 = vmatprep.subr.bf16.mxu1 %v1499_v40 }
 0x18c   :  { %1182 = vmatpush3.bf16.msra.mxu1 %v1361_v1 }
 0x18d   :  { %1183 = vmatprep.subr.bf16.mxu1 %v1499_v40 }
 0x190   :  { %1184 = vmatpush3.bf16.msra.mxu1 %v1362_v2 }
 0x191   :  { %1185 = vmatprep.subr.bf16.mxu1 %v1499_v40 }
 0x194   :  { %1186 = vmatpush3.bf16.msra.mxu1 %v1363_v3 }
 0x195   :  { %1187 = vmatprep.subr.bf16.mxu1 %v1499_v40 }
 0x198   :  { %1188 = vmatpush3.bf16.msra.mxu1 %v1364_v4 }
 0x199   :  { %1189 = vmatprep.subr.bf16.mxu1 %v1499_v40 }
 0x19c   :  { %1190 = vmatpush3.bf16.msra.mxu1 %v1365_v5 }
 0x19d   :  { %1191 = vmatprep.subr.bf16.mxu1 %v1499_v40 }
 0x1a0   :  { %1192 = vmatpush3.bf16.msra.mxu1 %v1366_v6 }
 0x1a1   :  { %1193 = vmatprep.subr.bf16.mxu1 %v1499_v40 }
 0x1a4   :  { %1194 = vmatpush3.bf16.msra.mxu1 %v1367_v7 }
 0x25a   :  { %v1164_v8 = vpop.f32.mrb[4].mxu1 }
 0x25b   :  { %v1165_v10 = vpop.f32.mrb[5].mxu1 }
 0x25c   :  { %v1166_v11 = vadd.f32 %v1165_v10, %v1164_v8  ;;  %v1167_v12 = vpop.f32.mrb[6].mxu1 }
 0x25d   :  { %v1168_v13 = vpop.f32.mrb[7].mxu1 }
 0x25e   :  { %v891_v14 = vadd.f32 %v1166_v11, %v1122_v9 }
 0x260   :  { %v896_v15 = vmax.f32 %v891_v14, 0.0 }
 0x262   :  { %v897_v16 = vpack.c.bf16 %v896_v15, %v896_v15 }
 0x264   :  { %1196 = vmatmul.mubr.bf16.vlgmr.msra.gmra.mrb[8].mxu1 %v897_v16 }
 0x337   :  { %v1003_v18 = vpop.f32.mrb[8].mxu1 }
 0x338   :  { %v1004_v19 = vadd.f32 %v1139_v17, %v1003_v18  ;;  %v1197_v20 = vpop.f32.mrb[9].mxu1 }
 0x339   :  { %v1006_v21 = vpop.f32.mrb[10].mxu1 }
 0x33a   :  { %1009 = vmax.xlane.f32.xlu0 %v1004_v19  ;;  %v1198_v22 = vpop.f32.mrb[11].mxu1 }
 0x3c7   :  { %v1010_v23 = vpop.xlane.xlu0 %1009 }
 0x3c8   :  { %v1011_v24 = vsub.f32 %v1004_v19, %v1010_v23 }
 0x3ca   :  { %v1012_v25 = vmul.f32 1.442695, %v1011_v24 }
 0x3cc   :  { %1368 = vpow2.f32 %v1012_v25 }
 0x3d6   :  { %v1369_v26 = vpop.eup %1368 }
 0x3d7   :  { %1014 = vadd.xlane.f32.xlu0 %v1369_v26 }
 0x464   :  { %v1015_v27 = vpop.xlane.xlu0 %1014 }
 0x465   :  { %1370 = vlog2.f32 %v1015_v27 }
 0x46f   :  { %v1371_v28 = vpop.eup %1370 }
 0x470   :  { %v1017_v29 = vmul.f32 0.6931472, %v1371_v28 }
 0x472   :  { %v1018_v30 = vsub.f32 %v1011_v24, %v1017_v29 }
 0x474   :  { %1019 = vst [vmem:[#allocation10] sm:$0xff] %v1018_v30 }
 0x475   :  { %1471 = shalt.err (!%p1468_p8)
}
 0x476   :  { %s1472_s10 = scalar_lea.hbm %s1624_s7, 128 }
 0x477   :  { %p1473_p9 = scmp.ne.s32.totalorder %s1624_s7, %s1472_s10  ;;  %p1476_p10 = scmp.lt.u32.totalorder %s1472_s10, %s1624_s7 }
 0x479   :  { %p1478_p11 = pnand %p1476_p10, %p1473_p9 }
 0x47b   :  { %1481 = shalt.err (!%p1478_p11)
}
 0x47c   :  { %1029 = dma.vmem_to_hbm [thread:$0]  %s1027_s30, 128, %s1624_s7, [#allocation4]  }
 0x47d   :  { %1488 = dma.done.wait [#allocation4], 128  }
 0x47e   :  { %1489 = vsyncadd [#allocation4], 4294967168 }
 0x47f   :  { %1033 = vsyncpa [#allocation3], 1 }
 0x480   :  { %1034 = vsyncpa [#allocation6], 1 }
 0x481   :  { %1035 = vsyncpa [#allocation9], 1 }
 0x482   :  { %1036 = vsyncpa [#allocation4], 1 }

</bundles_post_ra>
